<compile_context>
chip_gen: v6e
topology: v6e:2x2x1
jax: 0.10.0
libtpu: 0.0.40
codegen_flags: <defaults>
</compile_context>

<pallas_src>
import functools

import numpy as np
import jax
import jax.numpy as jnp
from jax.experimental import pallas as pl
from jax.experimental.pallas import tpu as pltpu


def _round_up(x, m):
    return ((x + m - 1) // m) * m


def _hgnn_kernel(g_ref, xw_ref, o_ref, *scratch, tk, xw_resident, matmul_dtype):
    """out[i] = relu( sum_k G[i, k] @ XW[k] ).

    g_ref : (tm, tk)            tile of G (native dtype; cast in-kernel)
    xw_ref: (Nk_pad, H) or (tk, H)  resident or tiled XW = x @ W1 + b1
    o_ref : (tm, H)             output row tile (resident across the k axis)
    scratch: optional (tm, H) f32 accumulator (only for non-f32 outputs)
    """
    k = pl.program_id(1)
    # For f32 outputs accumulate directly into the resident output tile.
    acc_ref = scratch[0] if scratch else o_ref

    @pl.when(k == 0)
    def _():
        acc_ref[...] = jnp.zeros_like(acc_ref)

    g = g_ref[...].astype(matmul_dtype)          # in-kernel cast: no HBM copy of G
    if xw_resident:
        start = pl.multiple_of(k * tk, tk)
        xw = xw_ref[pl.ds(start, tk), :]
    else:
        xw = xw_ref[...]

    acc_ref[...] += jnp.dot(g, xw, preferred_element_type=jnp.float32)

    @pl.when(k == pl.num_programs(1) - 1)
    def _():
        o_ref[...] = jnp.maximum(acc_ref[...], 0.0).astype(o_ref.dtype)


@functools.partial(jax.jit, static_argnames=("tm", "tk", "matmul_dtype"))
def hgnn_forward(x, G, W1, b1, *, tm=512, tk=2048, matmul_dtype=jnp.bfloat16):
    N, _ = x.shape
    H = W1.shape[1]
    assert G.shape == (N, N)
    out_dtype = x.dtype

    # ---- tile selection ------------------------------------------------------
    tm = max(8, _round_up(min(tm, N), 8))        # sublane-aligned row tile
    tk = max(128, _round_up(min(tk, N), 128))    # lane-aligned reduction tile
    # Keep >= 2 row tiles for medium/large N so the "parallel" axis can shard
    # across v7x's two TensorCores.
    if N >= 1024:
        tm = min(tm, _round_up(-(-N // 2), 8))

    nr_pad = _round_up(N, tm)    # padded row count
    nk_pad = _round_up(N, tk)    # padded reduction count

    # ---- hoisted small matmul: XW = x @ W1 + b1 (f32 epilogue), cast for MXU --
    xw = (jnp.dot(x, W1, preferred_element_type=jnp.float32)
          + b1.reshape(1, H).astype(jnp.float32)).astype(matmul_dtype)

    # ---- zero-pad to the tile grid (padded K rows of XW are zero) ------------
    g_in = G
    if nr_pad != N or nk_pad != N:
        g_in = jnp.pad(G, ((0, nr_pad - N), (0, nk_pad - N)))
    if nk_pad != N:
        xw = jnp.pad(xw, ((0, nk_pad - N), (0, 0)))

    g_bytes = np.dtype(g_in.dtype).itemsize
    xw_bytes = np.dtype(matmul_dtype).itemsize
    out_bytes = np.dtype(out_dtype).itemsize
    use_acc = np.dtype(out_dtype) != np.dtype(np.float32)

    # XW stays VMEM-resident (fetched once) when it comfortably fits next to the
    # G / output pipeline buffers inside v7x's 64 MiB per-core VMEM.
    xw_resident = nk_pad * H * xw_bytes <= 12 * 1024 * 1024
    xw_buf = nk_pad * H * xw_bytes if xw_resident else tk * H * xw_bytes

    vmem_est = (2 * tm * tk * g_bytes            # G double-buffer
                + 2 * xw_buf                     # XW (resident or double-buffered)
                + 2 * tm * H * out_bytes         # output double-buffer
                + (tm * H * 4 if use_acc else 0))
    vmem_limit = int(min(56 * 1024 * 1024,
                         max(32 * 1024 * 1024, vmem_est + 8 * 1024 * 1024)))

    grid = (nr_pad // tm, nk_pad // tk)          # (row tiles, reduction tiles)

    in_specs = [pl.BlockSpec((tm, tk), lambda i, k: (i, k))]      # G tile
    if xw_resident:
        in_specs.append(pl.BlockSpec((nk_pad, H), lambda i, k: (0, 0)))  # fetched once
    else:
        in_specs.append(pl.BlockSpec((tk, H), lambda i, k: (k, 0)))

    scratch_shapes = [pltpu.VMEM((tm, H), jnp.float32)] if use_acc else []

    xw_reads = 1 if xw_resident else (nr_pad // tm)
    cost = pl.CostEstimate(
        flops=2 * nr_pad * nk_pad * H,
        transcendentals=0,
        bytes_accessed=(nr_pad * nk_pad * g_bytes
                        + xw_reads * nk_pad * H * xw_bytes
                        + nr_pad * H * out_bytes),
    )

    kernel = functools.partial(_hgnn_kernel, tk=tk, xw_resident=xw_resident,
                               matmul_dtype=matmul_dtype)

    out = pl.pallas_call(
        kernel,
        out_shape=jax.ShapeDtypeStruct((nr_pad, H), out_dtype),
        grid_spec=pltpu.PrefetchScalarGridSpec(
            num_scalar_prefetch=0,
            grid=grid,
            in_specs=in_specs,
            out_specs=pl.BlockSpec((tm, H), lambda i, k: (i, 0)),
            scratch_shapes=scratch_shapes,
        ),
        compiler_params=pltpu.CompilerParams(
            dimension_semantics=("parallel", "arbitrary"),
            vmem_limit_bytes=vmem_limit,
        ),
        cost_estimate=cost,
    )(g_in, xw)

    return out[:N] if nr_pad != N else out


if __name__ == "__main__":
    # Small, deterministic shapes: N nodes, in_ch features, n_hid hidden units.
    N, in_ch, n_hid = 256, 64, 128

    key = jax.random.PRNGKey(0)
    kx, kg, kw1, kb1 = jax.random.split(key, 4)

    x = jax.random.normal(kx, (N, in_ch), dtype=jnp.float32)
    G = jax.random.normal(kg, (N, N), dtype=jnp.float32) / jnp.sqrt(jnp.float32(N))

    # Mimics uniform(-stdv, stdv) from HGNN_conv.reset_parameters.
    stdv1 = 1.0 / float(np.sqrt(n_hid))
    W1 = jax.random.uniform(kw1, (in_ch, n_hid), jnp.float32, -stdv1, stdv1)
    b1 = jax.random.uniform(kb1, (n_hid,), jnp.float32, -stdv1, stdv1)
    # NOTE: hgc2 params and dropout exist in __init__ but forward() only does relu(hgc1(x, G)).

    out = jax.block_until_ready(hgnn_forward(x, G, W1, b1))
    assert out.shape == (N, n_hid)

    # Reference with matched matmul dtype (bf16 operands, f32 accumulation).
    xw_ref = x @ W1 + b1
    ref_matched = jnp.maximum(
        jnp.dot(G.astype(jnp.bfloat16), xw_ref.astype(jnp.bfloat16),
                preferred_element_type=jnp.float32),
        0.0,
    ).astype(x.dtype)
    assert jnp.allclose(out, ref_matched, atol=5e-3, rtol=5e-3), \
        "mismatch vs matched-dtype reference"

    # Sanity check vs full-f32 reference (looser tolerance due to bf16 operands).
    ref_f32 = jnp.maximum(G @ xw_ref, 0.0)
    assert jnp.allclose(out, ref_f32, atol=5e-2, rtol=5e-2), \
        "mismatch vs f32 reference"

    print("KERNEL_OK")
</pallas_src>

<mosaic_0001>
module attributes {stable_mosaic.version = 11 : i64} {
  func.func @_hgnn_kernel(%arg0: i32, %arg1: i32, %arg2: memref<256x256xf32, #tpu.memory_space<vmem>>, %arg3: memref<256x128xbf16, #tpu.memory_space<vmem>>, %arg4: memref<256x128xf32, #tpu.memory_space<vmem>>) attributes {dimension_semantics = [#tpu.dimension_semantics<parallel>, #tpu.dimension_semantics<arbitrary>], iteration_bounds = array<i64: 1, 1>, scalar_prefetch = 0 : i64, scratch_operands = 0 : i64, tpu.core_type = #tpu.core_type<tc>, window_params = [{transform_indices = @transform_0, window_bounds = array<i64: 256, 256>}, {pipeline_mode = #tpu.pipeline_mode<synchronous>, transform_indices = @transform_1, window_bounds = array<i64: 256, 128>}, {transform_indices = @transform_2, window_bounds = array<i64: 256, 128>}]} {
    %c0_i32 = arith.constant 0 : i32
    %0 = arith.cmpi eq, %arg1, %c0_i32 : i32
    %1 = arith.extui %0 : i1 to i32
    %c0_i32_0 = arith.constant 0 : i32
    %2 = arith.cmpi ne, %1, %c0_i32_0 : i32
    scf.if %2 {
      %cst_9 = arith.constant 0.000000e+00 : f32
      %16 = vector.broadcast %cst_9 : f32 to vector<256x128xf32>
      %c0_10 = arith.constant 0 : index
      %c0_11 = arith.constant 0 : index
      %17 = vector.load %arg4[%c0_10, %c0_11] : memref<256x128xf32, #tpu.memory_space<vmem>>, vector<256x128xf32>
      tpu.vector_store %arg4[%c0_10, %c0_11], %16 {strides = array<i32>} : memref<256x128xf32, #tpu.memory_space<vmem>>, vector<256x128xf32>,
    } else {
    }
    %c0 = arith.constant 0 : index
    %c0_1 = arith.constant 0 : index
    %3 = vector.load %arg2[%c0, %c0_1] : memref<256x256xf32, #tpu.memory_space<vmem>>, vector<256x256xf32>
    %4 = arith.truncf %3 : vector<256x256xf32> to vector<256x256xbf16>
    %c256_i32 = arith.constant 256 : i32
    %5 = arith.muli %arg1, %c256_i32 : i32
    %6 = tpu.assume_multiple %5, 256 : i32
    %7 = arith.index_cast %6 : i32 to index
    %c0_2 = arith.constant 0 : index
    %8 = vector.load %arg3[%7, %c0_2] : memref<256x128xbf16, #tpu.memory_space<vmem>>, vector<256x128xbf16>
    %c0_3 = arith.constant 0 : index
    %c0_4 = arith.constant 0 : index
    %9 = vector.load %arg4[%c0_3, %c0_4] : memref<256x128xf32, #tpu.memory_space<vmem>>, vector<256x128xf32>
    %cst = arith.constant dense<0.000000e+00> : vector<256x128xf32>
    %10 = tpu.matmul %4, %8, %cst {dimension_numbers = #tpu.dot_dimension_numbers<[1], [0], [0], [1], [0, 0, 1, 1], [], []>} : vector<256x256xbf16>, vector<256x128xbf16>, vector<256x128xf32> -> vector<256x128xf32>
    %11 = arith.addf %9, %10 : vector<256x128xf32>
    %c0_5 = arith.constant 0 : index
    %c0_6 = arith.constant 0 : index
    %12 = vector.load %arg4[%c0_5, %c0_6] : memref<256x128xf32, #tpu.memory_space<vmem>>, vector<256x128xf32>
    tpu.vector_store %arg4[%c0_5, %c0_6], %11 {strides = array<i32>} : memref<256x128xf32, #tpu.memory_space<vmem>>, vector<256x128xf32>,
    %c0_i32_7 = arith.constant 0 : i32
    %13 = arith.cmpi eq, %arg1, %c0_i32_7 : i32
    %14 = arith.extui %13 : i1 to i32
    %c0_i32_8 = arith.constant 0 : i32
    %15 = arith.cmpi ne, %14, %c0_i32_8 : i32
    scf.if %15 {
      %c0_9 = arith.constant 0 : index
      %c0_10 = arith.constant 0 : index
      %16 = vector.load %arg4[%c0_9, %c0_10] : memref<256x128xf32, #tpu.memory_space<vmem>>, vector<256x128xf32>
      %cst_11 = arith.constant 0.000000e+00 : f32
      %17 = vector.broadcast %cst_11 : f32 to vector<256x128xf32>
      %18 = arith.maximumf %16, %17 : vector<256x128xf32>
      %c0_12 = arith.constant 0 : index
      %c0_13 = arith.constant 0 : index
      %19 = vector.load %arg4[%c0_12, %c0_13] : memref<256x128xf32, #tpu.memory_space<vmem>>, vector<256x128xf32>
      tpu.vector_store %arg4[%c0_12, %c0_13], %18 {strides = array<i32>} : memref<256x128xf32, #tpu.memory_space<vmem>>, vector<256x128xf32>,
    } else {
    }
    return
  }
  func.func @transform_0(%arg0: i32, %arg1: i32) -> (i32, i32) {
    %c0_i32 = arith.constant 0 : i32
    return %arg0, %arg1 : i32, i32
  }
  func.func @transform_1(%arg0: i32, %arg1: i32) -> (i32, i32) {
    %c0_i32 = arith.constant 0 : i32
    %c0_i32_0 = arith.constant 0 : i32
    %c0_i32_1 = arith.constant 0 : i32
    return %c0_i32, %c0_i32_0 : i32, i32
  }
  func.func @transform_2(%arg0: i32, %arg1: i32) -> (i32, i32) {
    %c0_i32 = arith.constant 0 : i32
    %c0_i32_0 = arith.constant 0 : i32
    return %arg0, %c0_i32 : i32, i32
  }
}

</mosaic_0001>

<bundles_post_ra>
// kernel: hgnn_forward.1
= control target key start
LH: loop header
LB: loop body
LE: loop exit
PB: predicated region body
PF: predicated region fallthrough
CT: control target
= control target key end

     0   :  { %7 = vsyncpa [#allocation3], 0  ;;  %s953_s0 = inlined_call_operand.hbm [shape: f32[256,256], index: 0, kind: input, shape index: {}]   ;;  %s954_s1 = inlined_call_operand.vmem [shape: bf16[256,128], index: 1, kind: input, shape index: {}]   ;;  %s955_s2 = inlined_call_operand.hbm [shape: f32[256,128], index: 2, kind: output, shape index: {}]  }
   0x1   :  { %8 = vsyncpa [#allocation4], 0  ;;  %s878_s9 = smov [#allocation2]  }
   0x2   :  { %s14_s10 = sshll.u32 %s878_s9, 4  ;;  %s15_s10 = int_to_ptr.vmem [resolvable:$true] %s14_s10 }
   0x3   :  { %s842_s11 = scalar_lea.vmem %s15_s10, 8192  ;;  %p847_p1 = scmp.lt.s32.totalorder %s15_s10, %s15_s10 }
   0x4   :  { %p843_p0 = scmp.ne.s32.totalorder %s15_s10, %s842_s11  ;;  %p848_p2 = scmp.lt.s32.totalorder %s842_s11, %s842_s11 }
   0x6   :  { %p849_p3 = por %p848_p2, %p847_p1 }
   0x8   :  { %p850_p4 = pnand %p849_p3, %p843_p0 }
   0xa   :  { %853 = shalt.err (!%p850_p4)
}
   0xb   :  { %s879_s12 = smov 256   ;;  %s880_s13 = smov 16  }
   0xc   :  { %20 = dma.hbm_to_vmem [thread:$0]  %s953_s0, 8192, %s15_s10, [#allocation3], %s879_s12, %s879_s12, %s880_s13  }
   0xd   :  { %874 = dma.done.wait [#allocation3], 8192  }
   0xe   :  { %875 = vsyncadd [#allocation3], 4294959104  ;;  %v818_v0 = vld [vmem:[%s954_s1 + $0x78] sm:$0xff]   ;;  %v820_v2 = vld [vmem:[%s954_s1 + $0x70] sm:$0xff]  }
   0xf   :  { %v819_v1 = vld [vmem:[%s954_s1 + $0x38] sm:$0xff]   ;;  %683 = vmatprep.subr.bf16.mxu0 %v818_v0  ;;  %795 = vmatprep.subr.bf16.mxu1 %v818_v0  ;;  %v821_v3 = vld [vmem:[%s954_s1 + $0x30] sm:$0xff]   ;;  %v822_v4 = vld [vmem:[%s954_s1 + $0x68] sm:$0xff]  }
  0x10   :  { %684 = vmatpush3.bf16.msra.mxu0 %v819_v1  ;;  %803 = vmatpush3.bf16.msra.mxu1 %v819_v1  ;;  %v823_v5 = vld [vmem:[%s954_s1 + $0x28] sm:$0xff]   ;;  %v824_v6 = vld [vmem:[%s954_s1 + $0x60] sm:$0xff]   ;;  %v826_v8 = vld [vmem:[%s954_s1 + $0x58] sm:$0xff]  }
  0x11   :  { %685 = vmatprep.subr.bf16.mxu0 %v820_v2  ;;  %796 = vmatprep.subr.bf16.mxu1 %v820_v2  ;;  %v825_v7 = vld [vmem:[%s954_s1 + $0x20] sm:$0xff]   ;;  %v827_v9 = vld [vmem:[%s954_s1 + $0x18] sm:$0xff]   ;;  %v828_v10 = vld [vmem:[%s954_s1 + $0x50] sm:$0xff]  }
  0x12   :  { %v64_v11 = vld [vmem:[#allocation2 + $0x8] sm:$0xff]  ;;  %v66_v12 = vld [vmem:[#allocation2 + $0x18] sm:$0xff]  ;;  %v829_v17 = vld [vmem:[%s954_s1 + $0x10] sm:$0xff]  }
  0x13   :  { %v96_v13 = vld [vmem:[#allocation2 + $0x108] sm:$0xff]  ;;  %v128_v14 = vpack.c.bf16 %v66_v12, %v64_v11  ;;  %v98_v15 = vld [vmem:[#allocation2 + $0x118] sm:$0xff]  ;;  %v832_v20 = vld [vmem:[%s954_s1 + $0x40] sm:$0xff]  }
  0x14   :  { %686 = vmatpush3.bf16.msra.mxu0 %v821_v3  ;;  %804 = vmatpush3.bf16.msra.mxu1 %v821_v3  ;;  %v144_v16 = vpack.c.bf16 %v98_v15, %v96_v13  ;;  %v830_v18 = vld [vmem:[%s954_s1 + $0x48] sm:$0xff]   ;;  %v833_v21 = vld [vmem:[%s954_s1] sm:$0xff]   ;;  %v65_v23 = vld [vmem:[#allocation2 + $0x10] sm:$0xff] }
  0x15   :  { %687 = vmatprep.subr.bf16.mxu0 %v822_v4  ;;  %797 = vmatprep.subr.bf16.mxu1 %v822_v4  ;;  %v831_v19 = vld [vmem:[%s954_s1 + $0x8] sm:$0xff]   ;;  %v63_v22 = vld [vmem:[#allocation2] sm:$0xff]  ;;  %v97_v25 = vld [vmem:[#allocation2 + $0x110] sm:$0xff]  ;;  %s881_s1 = smov [#allocation5]  }
  0x16   :  { %356 = vmatprep.mubr.bf16.mxu0 %v128_v14  ;;  %420 = vmatprep.mubr.bf16.mxu1 %v144_v16  ;;  %v95_v24 = vld [vmem:[#allocation2 + $0x100] sm:$0xff]  ;;  %v68_v26 = vld [vmem:[#allocation2 + $0x28] sm:$0xff]  ;;  %v70_v27 = vld [vmem:[#allocation2 + $0x38] sm:$0xff]  ;;  %v127_v30 = vpack.c.bf16 %v65_v23, %v63_v22  ;;  %s653_s19 = sshll.u32 %s881_s1, 4  ;;  %s654_s19 = int_to_ptr.vmem [resolvable:$true] %s653_s19 }
  0x17   :  { %v100_v28 = vld [vmem:[#allocation2 + $0x128] sm:$0xff]  ;;  %v102_v29 = vld [vmem:[#allocation2 + $0x138] sm:$0xff]  ;;  %v143_v31 = vpack.c.bf16 %v97_v25, %v95_v24  ;;  %v130_v32 = vpack.c.bf16 %v70_v27, %v68_v26  ;;  %v67_v34 = vld [vmem:[#allocation2 + $0x20] sm:$0xff]  ;;  %s854_s20 = scalar_lea.vmem %s654_s19, 4096  ;;  %p859_p6 = scmp.lt.s32.totalorder %s654_s19, %s654_s19 }
  0x18   :  { %688 = vmatpush3.bf16.msra.mxu0 %v823_v5  ;;  %805 = vmatpush3.bf16.msra.mxu1 %v823_v5  ;;  %v146_v33 = vpack.c.bf16 %v102_v29, %v100_v28  ;;  %v69_v35 = vld [vmem:[#allocation2 + $0x30] sm:$0xff]  ;;  %v99_v36 = vld [vmem:[#allocation2 + $0x120] sm:$0xff]  ;;  %v72_v38 = vld [vmem:[#allocation2 + $0x48] sm:$0xff]  ;;  %p855_p5 = scmp.ne.s32.totalorder %s654_s19, %s854_s20  ;;  %p860_p7 = scmp.lt.s32.totalorder %s854_s20, %s854_s20 }
  0x19   :  { %689 = vmatprep.subr.bf16.mxu0 %v824_v6  ;;  %798 = vmatprep.subr.bf16.mxu1 %v824_v6  ;;  %v101_v37 = vld [vmem:[#allocation2 + $0x130] sm:$0xff]  ;;  %v74_v39 = vld [vmem:[#allocation2 + $0x58] sm:$0xff]  ;;  %v104_v40 = vld [vmem:[#allocation2 + $0x148] sm:$0xff]  ;;  %v129_v42 = vpack.c.bf16 %v69_v35, %v67_v34 }
  0x1a   :  { %v106_v41 = vld [vmem:[#allocation2 + $0x158] sm:$0xff]  ;;  %v145_v43 = vpack.c.bf16 %v101_v37, %v99_v36  ;;  %v132_v44 = vpack.c.bf16 %v74_v39, %v72_v38  ;;  %v71_v46 = vld [vmem:[#allocation2 + $0x40] sm:$0xff]  ;;  %v73_v47 = vld [vmem:[#allocation2 + $0x50] sm:$0xff]  ;;  %p861_p8 = por %p860_p7, %p859_p6 }
  0x1b   :  { %v148_v45 = vpack.c.bf16 %v106_v41, %v104_v40  ;;  %v103_v48 = vld [vmem:[#allocation2 + $0x140] sm:$0xff]  ;;  %v105_v49 = vld [vmem:[#allocation2 + $0x150] sm:$0xff]  ;;  %v76_v50 = vld [vmem:[#allocation2 + $0x68] sm:$0xff]  ;;  %v131_v54 = vpack.c.bf16 %v73_v47, %v71_v46 }
  0x1c   :  { %690 = vmatpush3.bf16.msra.mxu0 %v825_v7  ;;  %806 = vmatpush3.bf16.msra.mxu1 %v825_v7  ;;  %v78_v51 = vld [vmem:[#allocation2 + $0x78] sm:$0xff]  ;;  %v108_v52 = vld [vmem:[#allocation2 + $0x168] sm:$0xff]  ;;  %v147_v55 = vpack.c.bf16 %v105_v49, %v103_v48  ;;  %v75_v58 = vld [vmem:[#allocation2 + $0x60] sm:$0xff]  ;;  %p862_p9 = pnand %p861_p8, %p855_p5 }
  0x1d   :  { %691 = vmatprep.subr.bf16.mxu0 %v826_v8  ;;  %799 = vmatprep.subr.bf16.mxu1 %v826_v8  ;;  %v110_v53 = vld [vmem:[#allocation2 + $0x178] sm:$0xff]  ;;  %v134_v56 = vpack.c.bf16 %v78_v51, %v76_v50  ;;  %v77_v59 = vld [vmem:[#allocation2 + $0x70] sm:$0xff]  ;;  %v107_v60 = vld [vmem:[#allocation2 + $0x160] sm:$0xff] }
  0x1e   :  { %v150_v57 = vpack.c.bf16 %v110_v53, %v108_v52  ;;  %v109_v61 = vld [vmem:[#allocation2 + $0x170] sm:$0xff]  ;;  %v80_v62 = vld [vmem:[#allocation2 + $0x88] sm:$0xff]  ;;  %v82_v63 = vld [vmem:[#allocation2 + $0x98] sm:$0xff]  ;;  %v133_v2 = vpack.c.bf16 %v77_v59, %v75_v58 }
  0x1f   :  { %v112_v0 = vld [vmem:[#allocation2 + $0x188] sm:$0xff]  ;;  %v114_v1 = vld [vmem:[#allocation2 + $0x198] sm:$0xff]  ;;  %v149_v3 = vpack.c.bf16 %v109_v61, %v107_v60  ;;  %v136_v4 = vpack.c.bf16 %v82_v63, %v80_v62  ;;  %v79_v6 = vld [vmem:[#allocation2 + $0x80] sm:$0xff] }
  0x20   :  { %692 = vmatpush3.bf16.msra.mxu0 %v827_v9  ;;  %807 = vmatpush3.bf16.msra.mxu1 %v827_v9  ;;  %v152_v5 = vpack.c.bf16 %v114_v1, %v112_v0  ;;  %v81_v7 = vld [vmem:[#allocation2 + $0x90] sm:$0xff]  ;;  %v111_v8 = vld [vmem:[#allocation2 + $0x180] sm:$0xff]  ;;  %v86_v11 = vld [vmem:[#allocation2 + $0xb8] sm:$0xff] }
  0x21   :  { %693 = vmatprep.subr.bf16.mxu0 %v828_v10  ;;  %800 = vmatprep.subr.bf16.mxu1 %v828_v10  ;;  %v113_v9 = vld [vmem:[#allocation2 + $0x190] sm:$0xff]  ;;  %v84_v10 = vld [vmem:[#allocation2 + $0xa8] sm:$0xff]  ;;  %v118_v13 = vld [vmem:[#allocation2 + $0x1b8] sm:$0xff]  ;;  %v135_v14 = vpack.c.bf16 %v81_v7, %v79_v6 }
  0x22   :  { %v116_v12 = vld [vmem:[#allocation2 + $0x1a8] sm:$0xff]  ;;  %v151_v15 = vpack.c.bf16 %v113_v9, %v111_v8  ;;  %v138_v16 = vpack.c.bf16 %v86_v11, %v84_v10  ;;  %v90_v23 = vld [vmem:[#allocation2 + $0xd8] sm:$0xff] }
  0x23   :  { %v88_v22 = vld [vmem:[#allocation2 + $0xc8] sm:$0xff]  ;;  %v122_v25 = vld [vmem:[#allocation2 + $0x1d8] sm:$0xff] }
  0x24   :  { %694 = vmatpush3.bf16.msra.mxu0 %v829_v17  ;;  %808 = vmatpush3.bf16.msra.mxu1 %v829_v17  ;;  %v154_v17 = vpack.c.bf16 %v118_v13, %v116_v12  ;;  %v120_v24 = vld [vmem:[#allocation2 + $0x1c8] sm:$0xff]  ;;  %v140_v28 = vpack.c.bf16 %v90_v23, %v88_v22  ;;  %v94_v35 = vld [vmem:[#allocation2 + $0xf8] sm:$0xff] }
  0x25   :  { %695 = vmatprep.subr.bf16.mxu0 %v830_v18  ;;  %801 = vmatprep.subr.bf16.mxu1 %v830_v18  ;;  %v83_v18 = vld [vmem:[#allocation2 + $0xa0] sm:$0xff]  ;;  %v156_v29 = vpack.c.bf16 %v122_v25, %v120_v24  ;;  %v92_v34 = vld [vmem:[#allocation2 + $0xe8] sm:$0xff]  ;;  %v126_v37 = vld [vmem:[#allocation2 + $0x1f8] sm:$0xff] }
  0x26   :  { %v124_v36 = vld [vmem:[#allocation2 + $0x1e8] sm:$0xff]  ;;  %v142_v40 = vpack.c.bf16 %v94_v35, %v92_v34 }
  0x27   :  { %v158_v41 = vpack.c.bf16 %v126_v37, %v124_v36 }
  0x28   :  { %696 = vmatpush3.bf16.msra.mxu0 %v831_v19  ;;  %809 = vmatpush3.bf16.msra.mxu1 %v831_v19  ;;  %v85_v19 = vld [vmem:[#allocation2 + $0xb0] sm:$0xff] }
  0x29   :  { %697 = vmatprep.subr.bf16.mxu0 %v832_v20  ;;  %802 = vmatprep.subr.bf16.mxu1 %v832_v20  ;;  %v115_v20 = vld [vmem:[#allocation2 + $0x1a0] sm:$0xff]  ;;  %v137_v26 = vpack.c.bf16 %v85_v19, %v83_v18 }
  0x2c   :  { %698 = vmatpush3.bf16.msra.mxu0 %v833_v21  ;;  %810 = vmatpush3.bf16.msra.mxu1 %v833_v21  ;;  %v117_v21 = vld [vmem:[#allocation2 + $0x1b0] sm:$0xff] }
  0x2d   :  { %v153_v27 = vpack.c.bf16 %v117_v21, %v115_v20 }
  0x2f   :  { %357 = vmatmul.mubr.bf16.vlgmr.msra.gmra.mxu0 %v127_v30  ;;  %421 = vmatmul.mubr.bf16.vlgmr.msra.gmra.mxu1 %v143_v31  ;;  %v87_v30 = vld [vmem:[#allocation2 + $0xc0] sm:$0xff]  ;;  %v89_v31 = vld [vmem:[#allocation2 + $0xd0] sm:$0xff] }
  0x30   :  { %364 = vmatprep.mubr.bf16.mxu0 %v130_v32  ;;  %428 = vmatprep.mubr.bf16.mxu1 %v146_v33  ;;  %v119_v32 = vld [vmem:[#allocation2 + $0x1c0] sm:$0xff]  ;;  %v121_v33 = vld [vmem:[#allocation2 + $0x1d0] sm:$0xff]  ;;  %v139_v38 = vpack.c.bf16 %v89_v31, %v87_v30 }
  0x31   :  { %v155_v39 = vpack.c.bf16 %v121_v33, %v119_v32 }
  0x37   :  { %365 = vmatmul.mubr.bf16.gmra.mxu0 %v129_v42  ;;  %429 = vmatmul.mubr.bf16.gmra.mxu1 %v145_v43  ;;  %v91_v42 = vld [vmem:[#allocation2 + $0xe0] sm:$0xff]  ;;  %v93_v43 = vld [vmem:[#allocation2 + $0xf0] sm:$0xff] }
  0x38   :  { %372 = vmatprep.mubr.bf16.mxu0 %v132_v44  ;;  %436 = vmatprep.mubr.bf16.mxu1 %v148_v45  ;;  %v123_v44 = vld [vmem:[#allocation2 + $0x1e0] sm:$0xff]  ;;  %v125_v45 = vld [vmem:[#allocation2 + $0x1f0] sm:$0xff]  ;;  %v141_v46 = vpack.c.bf16 %v93_v43, %v91_v42 }
  0x39   :  { %v157_v47 = vpack.c.bf16 %v125_v45, %v123_v44 }
  0x3f   :  { %373 = vmatmul.mubr.bf16.gmra.mxu0 %v131_v54  ;;  %437 = vmatmul.mubr.bf16.gmra.mxu1 %v147_v55 }
  0x40   :  { %380 = vmatprep.mubr.bf16.mxu0 %v134_v56  ;;  %444 = vmatprep.mubr.bf16.mxu1 %v150_v57 }
  0x47   :  { %381 = vmatmul.mubr.bf16.gmra.mxu0 %v133_v2  ;;  %445 = vmatmul.mubr.bf16.gmra.mxu1 %v149_v3 }
  0x48   :  { %388 = vmatprep.mubr.bf16.mxu0 %v136_v4  ;;  %452 = vmatprep.mubr.bf16.mxu1 %v152_v5 }
  0x4f   :  { %389 = vmatmul.mubr.bf16.gmra.mxu0 %v135_v14  ;;  %453 = vmatmul.mubr.bf16.gmra.mxu1 %v151_v15 }
  0x50   :  { %396 = vmatprep.mubr.bf16.mxu0 %v138_v16  ;;  %460 = vmatprep.mubr.bf16.mxu1 %v154_v17 }
  0x57   :  { %397 = vmatmul.mubr.bf16.gmra.mxu0 %v137_v26  ;;  %461 = vmatmul.mubr.bf16.gmra.mxu1 %v153_v27 }
  0x58   :  { %404 = vmatprep.mubr.bf16.mxu0 %v140_v28  ;;  %468 = vmatprep.mubr.bf16.mxu1 %v156_v29 }
  0x5f   :  { %405 = vmatmul.mubr.bf16.gmra.mxu0 %v139_v38  ;;  %469 = vmatmul.mubr.bf16.gmra.mxu1 %v155_v39 }
  0x60   :  { %412 = vmatprep.mubr.bf16.mxu0 %v142_v40  ;;  %476 = vmatprep.mubr.bf16.mxu1 %v158_v41 }
  0x67   :  { %413 = vmatmul.mubr.bf16.gmra.mxu0 %v141_v46  ;;  %477 = vmatmul.mubr.bf16.gmra.mxu1 %v157_v47 }
  0xef   :  { %v699_v48 = vpop.f32.mrf.mxu0  ;;  %v747_v49 = vpop.f32.mrf.mxu1 }
  0xf1   :  { %v700_v50 = vpop.f32.mrf.mxu0  ;;  %v748_v51 = vpop.f32.mrf.mxu1 }
  0xf2   :  { %v701_v52 = vadd.f32 %v700_v50, %v699_v48  ;;  %v749_v53 = vadd.f32 %v748_v51, %v747_v49 }
  0xf3   :  { %v702_v54 = vpop.f32.mrf.mxu0  ;;  %v750_v55 = vpop.f32.mrf.mxu1 }
  0xf4   :  { %v584_v58 = vmax.f32 %v701_v52, 0.0  ;;  %v600_v59 = vmax.f32 %v749_v53, 0.0 }
  0xf5   :  { %v703_v56 = vpop.f32.mrf.mxu0  ;;  %v751_v57 = vpop.f32.mrf.mxu1 }
  0xf6   :  { %v704_v60 = vadd.f32 %v703_v56, %v702_v54  ;;  %v752_v61 = vadd.f32 %v751_v57, %v750_v55  ;;  %616 = vst [vmem:[#allocation5] sm:$0xff] %v584_v58  ;;  %632 = vst [vmem:[#allocation5 + $0x80] sm:$0xff] %v600_v59 }
  0xf7   :  { %v705_v62 = vpop.f32.mrf.mxu0  ;;  %v753_v63 = vpop.f32.mrf.mxu1 }
  0xf8   :  { %v585_v2 = vmax.f32 %v704_v60, 0.0  ;;  %v601_v3 = vmax.f32 %v752_v61, 0.0 }
  0xf9   :  { %v706_v0 = vpop.f32.mrf.mxu0  ;;  %v754_v1 = vpop.f32.mrf.mxu1 }
  0xfa   :  { %v707_v4 = vadd.f32 %v706_v0, %v705_v62  ;;  %v755_v5 = vadd.f32 %v754_v1, %v753_v63  ;;  %617 = vst [vmem:[#allocation5 + $0x8] sm:$0xff] %v585_v2  ;;  %633 = vst [vmem:[#allocation5 + $0x88] sm:$0xff] %v601_v3 }
  0xfb   :  { %v708_v6 = vpop.f32.mrf.mxu0  ;;  %v756_v7 = vpop.f32.mrf.mxu1 }
  0xfc   :  { %v586_v10 = vmax.f32 %v707_v4, 0.0  ;;  %v602_v11 = vmax.f32 %v755_v5, 0.0 }
  0xfd   :  { %v709_v8 = vpop.f32.mrf.mxu0  ;;  %v757_v9 = vpop.f32.mrf.mxu1 }
  0xfe   :  { %v710_v12 = vadd.f32 %v709_v8, %v708_v6  ;;  %v758_v13 = vadd.f32 %v757_v9, %v756_v7  ;;  %618 = vst [vmem:[#allocation5 + $0x10] sm:$0xff] %v586_v10  ;;  %634 = vst [vmem:[#allocation5 + $0x90] sm:$0xff] %v602_v11 }
  0xff   :  { %v711_v14 = vpop.f32.mrf.mxu0  ;;  %v759_v15 = vpop.f32.mrf.mxu1 }
 0x100   :  { %v587_v18 = vmax.f32 %v710_v12, 0.0  ;;  %v603_v19 = vmax.f32 %v758_v13, 0.0 }
 0x101   :  { %v712_v16 = vpop.f32.mrf.mxu0  ;;  %v760_v17 = vpop.f32.mrf.mxu1 }
 0x102   :  { %v713_v20 = vadd.f32 %v712_v16, %v711_v14  ;;  %v761_v21 = vadd.f32 %v760_v17, %v759_v15  ;;  %619 = vst [vmem:[#allocation5 + $0x18] sm:$0xff] %v587_v18  ;;  %635 = vst [vmem:[#allocation5 + $0x98] sm:$0xff] %v603_v19 }
 0x103   :  { %v714_v22 = vpop.f32.mrf.mxu0  ;;  %v762_v23 = vpop.f32.mrf.mxu1 }
 0x104   :  { %v588_v26 = vmax.f32 %v713_v20, 0.0  ;;  %v604_v27 = vmax.f32 %v761_v21, 0.0 }
 0x105   :  { %v715_v24 = vpop.f32.mrf.mxu0  ;;  %v763_v25 = vpop.f32.mrf.mxu1 }
 0x106   :  { %v716_v28 = vadd.f32 %v715_v24, %v714_v22  ;;  %v764_v29 = vadd.f32 %v763_v25, %v762_v23  ;;  %620 = vst [vmem:[#allocation5 + $0x20] sm:$0xff] %v588_v26  ;;  %636 = vst [vmem:[#allocation5 + $0xa0] sm:$0xff] %v604_v27 }
 0x107   :  { %v717_v30 = vpop.f32.mrf.mxu0  ;;  %v765_v31 = vpop.f32.mrf.mxu1 }
 0x108   :  { %v589_v34 = vmax.f32 %v716_v28, 0.0  ;;  %v605_v35 = vmax.f32 %v764_v29, 0.0 }
 0x109   :  { %v718_v32 = vpop.f32.mrf.mxu0  ;;  %v766_v33 = vpop.f32.mrf.mxu1 }
 0x10a   :  { %v719_v36 = vadd.f32 %v718_v32, %v717_v30  ;;  %v767_v37 = vadd.f32 %v766_v33, %v765_v31  ;;  %621 = vst [vmem:[#allocation5 + $0x28] sm:$0xff] %v589_v34  ;;  %637 = vst [vmem:[#allocation5 + $0xa8] sm:$0xff] %v605_v35 }
 0x10b   :  { %v720_v38 = vpop.f32.mrf.mxu0  ;;  %v768_v39 = vpop.f32.mrf.mxu1 }
 0x10c   :  { %v590_v42 = vmax.f32 %v719_v36, 0.0  ;;  %v606_v43 = vmax.f32 %v767_v37, 0.0 }
 0x10d   :  { %v721_v40 = vpop.f32.mrf.mxu0  ;;  %v769_v41 = vpop.f32.mrf.mxu1 }
 0x10e   :  { %v722_v44 = vadd.f32 %v721_v40, %v720_v38  ;;  %v770_v45 = vadd.f32 %v769_v41, %v768_v39  ;;  %622 = vst [vmem:[#allocation5 + $0x30] sm:$0xff] %v590_v42  ;;  %638 = vst [vmem:[#allocation5 + $0xb0] sm:$0xff] %v606_v43 }
 0x10f   :  { %v723_v46 = vpop.f32.mrf.mxu0  ;;  %v771_v47 = vpop.f32.mrf.mxu1 }
 0x110   :  { %v591_v50 = vmax.f32 %v722_v44, 0.0  ;;  %v607_v51 = vmax.f32 %v770_v45, 0.0 }
 0x111   :  { %v724_v48 = vpop.f32.mrf.mxu0  ;;  %v772_v49 = vpop.f32.mrf.mxu1 }
 0x112   :  { %v725_v52 = vadd.f32 %v724_v48, %v723_v46  ;;  %v773_v53 = vadd.f32 %v772_v49, %v771_v47  ;;  %623 = vst [vmem:[#allocation5 + $0x38] sm:$0xff] %v591_v50  ;;  %639 = vst [vmem:[#allocation5 + $0xb8] sm:$0xff] %v607_v51 }
 0x113   :  { %v726_v54 = vpop.f32.mrf.mxu0  ;;  %v774_v55 = vpop.f32.mrf.mxu1 }
 0x114   :  { %v592_v58 = vmax.f32 %v725_v52, 0.0  ;;  %v608_v59 = vmax.f32 %v773_v53, 0.0 }
 0x115   :  { %v727_v56 = vpop.f32.mrf.mxu0  ;;  %v775_v57 = vpop.f32.mrf.mxu1 }
 0x116   :  { %v728_v60 = vadd.f32 %v727_v56, %v726_v54  ;;  %v776_v61 = vadd.f32 %v775_v57, %v774_v55  ;;  %624 = vst [vmem:[#allocation5 + $0x40] sm:$0xff] %v592_v58  ;;  %640 = vst [vmem:[#allocation5 + $0xc0] sm:$0xff] %v608_v59 }
 0x117   :  { %v729_v62 = vpop.f32.mrf.mxu0  ;;  %v777_v63 = vpop.f32.mrf.mxu1 }
 0x118   :  { %v593_v2 = vmax.f32 %v728_v60, 0.0  ;;  %v609_v3 = vmax.f32 %v776_v61, 0.0 }
 0x119   :  { %v730_v0 = vpop.f32.mrf.mxu0  ;;  %v778_v1 = vpop.f32.mrf.mxu1 }
 0x11a   :  { %v731_v4 = vadd.f32 %v730_v0, %v729_v62  ;;  %v779_v5 = vadd.f32 %v778_v1, %v777_v63  ;;  %625 = vst [vmem:[#allocation5 + $0x48] sm:$0xff] %v593_v2  ;;  %641 = vst [vmem:[#allocation5 + $0xc8] sm:$0xff] %v609_v3 }
 0x11b   :  { %v732_v6 = vpop.f32.mrf.mxu0  ;;  %v780_v7 = vpop.f32.mrf.mxu1 }
 0x11c   :  { %v594_v10 = vmax.f32 %v731_v4, 0.0  ;;  %v610_v11 = vmax.f32 %v779_v5, 0.0 }
 0x11d   :  { %v733_v8 = vpop.f32.mrf.mxu0  ;;  %v781_v9 = vpop.f32.mrf.mxu1 }
 0x11e   :  { %v734_v12 = vadd.f32 %v733_v8, %v732_v6  ;;  %v782_v13 = vadd.f32 %v781_v9, %v780_v7  ;;  %626 = vst [vmem:[#allocation5 + $0x50] sm:$0xff] %v594_v10  ;;  %642 = vst [vmem:[#allocation5 + $0xd0] sm:$0xff] %v610_v11 }
 0x11f   :  { %v735_v14 = vpop.f32.mrf.mxu0  ;;  %v783_v15 = vpop.f32.mrf.mxu1 }
 0x120   :  { %v595_v18 = vmax.f32 %v734_v12, 0.0  ;;  %v611_v19 = vmax.f32 %v782_v13, 0.0 }
 0x121   :  { %v736_v16 = vpop.f32.mrf.mxu0  ;;  %v784_v17 = vpop.f32.mrf.mxu1 }
 0x122   :  { %v737_v20 = vadd.f32 %v736_v16, %v735_v14  ;;  %v785_v21 = vadd.f32 %v784_v17, %v783_v15  ;;  %627 = vst [vmem:[#allocation5 + $0x58] sm:$0xff] %v595_v18  ;;  %643 = vst [vmem:[#allocation5 + $0xd8] sm:$0xff] %v611_v19 }
 0x123   :  { %v738_v22 = vpop.f32.mrf.mxu0  ;;  %v786_v23 = vpop.f32.mrf.mxu1 }
 0x124   :  { %v596_v26 = vmax.f32 %v737_v20, 0.0  ;;  %v612_v27 = vmax.f32 %v785_v21, 0.0 }
 0x125   :  { %v739_v24 = vpop.f32.mrf.mxu0  ;;  %v787_v25 = vpop.f32.mrf.mxu1 }
 0x126   :  { %v740_v28 = vadd.f32 %v739_v24, %v738_v22  ;;  %v788_v29 = vadd.f32 %v787_v25, %v786_v23  ;;  %628 = vst [vmem:[#allocation5 + $0x60] sm:$0xff] %v596_v26  ;;  %644 = vst [vmem:[#allocation5 + $0xe0] sm:$0xff] %v612_v27 }
 0x127   :  { %v741_v30 = vpop.f32.mrf.mxu0  ;;  %v789_v31 = vpop.f32.mrf.mxu1 }
 0x128   :  { %v597_v34 = vmax.f32 %v740_v28, 0.0  ;;  %v613_v35 = vmax.f32 %v788_v29, 0.0 }
 0x129   :  { %v742_v32 = vpop.f32.mrf.mxu0  ;;  %v790_v33 = vpop.f32.mrf.mxu1 }
 0x12a   :  { %v743_v36 = vadd.f32 %v742_v32, %v741_v30  ;;  %v791_v37 = vadd.f32 %v790_v33, %v789_v31  ;;  %629 = vst [vmem:[#allocation5 + $0x68] sm:$0xff] %v597_v34  ;;  %645 = vst [vmem:[#allocation5 + $0xe8] sm:$0xff] %v613_v35 }
 0x12b   :  { %v744_v38 = vpop.f32.mrf.mxu0  ;;  %v792_v39 = vpop.f32.mrf.mxu1 }
 0x12c   :  { %v598_v42 = vmax.f32 %v743_v36, 0.0  ;;  %v614_v43 = vmax.f32 %v791_v37, 0.0 }
 0x12d   :  { %v745_v40 = vpop.f32.mrf.mxu0  ;;  %v793_v41 = vpop.f32.mrf.mxu1 }
 0x12e   :  { %v746_v44 = vadd.f32 %v745_v40, %v744_v38  ;;  %v794_v45 = vadd.f32 %v793_v41, %v792_v39  ;;  %630 = vst [vmem:[#allocation5 + $0x70] sm:$0xff] %v598_v42  ;;  %646 = vst [vmem:[#allocation5 + $0xf0] sm:$0xff] %v614_v43 }
 0x130   :  { %v599_v46 = vmax.f32 %v746_v44, 0.0  ;;  %v615_v47 = vmax.f32 %v794_v45, 0.0 }
 0x132   :  { %631 = vst [vmem:[#allocation5 + $0x78] sm:$0xff] %v599_v46  ;;  %647 = vst [vmem:[#allocation5 + $0xf8] sm:$0xff] %v615_v47 }
 0x133   :  { %865 = shalt.err (!%p862_p9)
}
 0x134   :  { %s882_s21 = smov 128   ;;  %s883_s22 = smov 8  }
 0x135   :  { %659 = dma.vmem_to_hbm [thread:$0]  %s654_s19, 4096, %s955_s2, [#allocation4], %s882_s21, %s882_s21, %s883_s22  }
 0x136   :  { %876 = dma.done.wait [#allocation4], 4096  }
 0x137   :  { %877 = vsyncadd [#allocation4], 4294963200 }
 0x138   :  { %663 = vsyncpa [#allocation3], 1 }
 0x139   :  { %664 = vsyncpa [#allocation4], 1 }

</bundles_post_ra>
